<compile_context>
chip_gen: v7x
topology: tpu7x:2x2x1
jax: 0.10.0
libtpu: 0.0.40
codegen_flags: <defaults>
</compile_context>

<pallas_src>
import functools

import jax
import jax.numpy as jnp
from jax.experimental import pallas as pl
from jax.experimental.pallas import tpu as pltpu


def _triplet_partial_kernel(a_ref, p_ref, n_ref, o_ref, *, m, batch, block_rows,
                            mask_last, use_mxu_reduce):
    """One batch tile per grid step; emits this block's hinge partial sum (lane-dense)."""
    i = pl.program_id(0)

    a = a_ref[...].astype(jnp.float32)
    p = p_ref[...].astype(jnp.float32)
    n = n_ref[...].astype(jnp.float32)

    dap = a - p
    dan = a - n

    if use_mxu_reduce:
        # Offload the per-row reduction over D to the (otherwise idle) MXU:
        # (tb, D) @ (D, 128) of squared diffs against ones -> every output lane holds
        # the row sum; take lane 0.  Relieves the VALU slot on bandwidth-rich v7x+bf16.
        ones = jnp.ones((dap.shape[-1], 128), jnp.float32)
        sq_ap = jnp.dot(dap * dap, ones, preferred_element_type=jnp.float32)[:, :1]
        sq_an = jnp.dot(dan * dan, ones, preferred_element_type=jnp.float32)[:, :1]
    else:
        sq_ap = jnp.sum(dap * dap, axis=-1, keepdims=True)   # (tb, 1)
        sq_an = jnp.sum(dan * dan, axis=-1, keepdims=True)   # (tb, 1)

    hinge = jnp.maximum(jnp.sqrt(sq_ap) - jnp.sqrt(sq_an) + jnp.float32(m), 0.0)

    def write(value):
        o_ref[...] = jnp.broadcast_to(value, (1, 8, 128)).astype(jnp.float32)

    if mask_last:
        last = pl.num_programs(0) - 1

        @pl.when(i == last)
        def _():
            # Mask rows past the true batch size.  Safe post-compute: jnp.where is a
            # select, so garbage/NaN in the padded rows does not propagate.
            row = i * block_rows + jax.lax.broadcasted_iota(
                jnp.int32, (block_rows, 1), 0)
            write(jnp.sum(jnp.where(row < batch, hinge, 0.0)))

        @pl.when(i != last)
        def _():
            write(jnp.sum(hinge))
    else:
        write(jnp.sum(hinge))


def _round_up(x, multiple):
    return ((x + multiple - 1) // multiple) * multiple


def _tpu_vmem_capacity_bytes():
    """Physical VMEM capacity (generation aware); conservative v7x default on failure."""
    try:
        cap = getattr(pltpu.get_tpu_info(), "vmem_capacity_bytes", None)
        if cap:
            return int(cap)
    except Exception:
        pass
    return 64 * 1024 * 1024


def _is_v7x():
    try:
        name = str(getattr(pltpu.get_tpu_info(), "chip_version", "")).lower()
        return "7" in name
    except Exception:
        return False


def _choose_block_rows(batch, d, in_itemsize, vmem_capacity,
                       target_step_bytes=12 * 1024 * 1024):
    """Largest batch tile meeting a bytes-per-step target under the VMEM budget."""
    # VMEM resident per row: 3 input streams x 2 pipeline buffers, plus ~5 f32
    # temporaries (a/p/n upcasts + two diffs) used by the in-kernel f32 math.
    per_row_inputs = 3 * 2 * d * in_itemsize
    per_row_temps = 5 * d * 4
    per_row_total = per_row_inputs + per_row_temps

    vmem_budget = int(vmem_capacity * 0.65)          # headroom: outputs, misc, slack
    rows_vmem = vmem_budget // max(per_row_total, 1)
    rows_target = target_step_bytes // max(3 * d * in_itemsize, 1)

    rows = min(rows_vmem, rows_target)
    rows = max(8, (rows // 16) * 16)

    # Never tile beyond the (padded) batch.
    rows = min(rows, max(_round_up(batch, 8), 8))

    # Keep >= 2 grid blocks when each half still streams >= ~1 MiB per step, so the
    # "parallel" grid axis can occupy both v7x TensorCores (harmless on 1-TC chips).
    half_rows = _round_up(-(-batch // 2), 16)
    if 3 * half_rows * d * in_itemsize >= (1 << 20):
        rows = min(rows, half_rows)

    return int(max(rows, 8))


def triplet_loss(anchor, positive, negative, m=1.0, block_rows=None,
                 vmem_limit_bytes=None, use_mxu_reduce=None):
    """Pallas TripletLoss forward. Inputs: (B, D) float arrays. Returns scalar f32 loss."""
    B, D = anchor.shape
    assert positive.shape == (B, D) and negative.shape == (B, D)
    # TODO(synk): for very large D (threshold derived from the per-generation VMEM
    # budget, i.e. ~half as large on v7x), add a trailing "arbitrary" grid axis over D
    # with a squared-distance accumulator; sqrt/hinge only at the final k-step.

    itemsize = jnp.dtype(anchor.dtype).itemsize
    vmem_capacity = _tpu_vmem_capacity_bytes()
    if block_rows is None:
        block_rows = _choose_block_rows(B, D, itemsize, vmem_capacity)
    if vmem_limit_bytes is None:
        vmem_limit_bytes = min(int(vmem_capacity * 7 // 8), 96 * 1024 * 1024)
    if use_mxu_reduce is None:
        # Only worth it where the VALU slot (not HBM bandwidth) would set the pace.
        use_mxu_reduce = _is_v7x() and anchor.dtype == jnp.bfloat16

    num_blocks = pl.cdiv(B, block_rows)
    mask_last = (B % block_rows) != 0

    kernel = functools.partial(
        _triplet_partial_kernel, m=float(m), batch=B, block_rows=block_rows,
        mask_last=bool(mask_last), use_mxu_reduce=bool(use_mxu_reduce))

    partials = pl.pallas_call(
        kernel,
        out_shape=jax.ShapeDtypeStruct((num_blocks, 8, 128), jnp.float32),
        grid_spec=pltpu.PrefetchScalarGridSpec(
            num_scalar_prefetch=0,
            grid=(num_blocks,),
            in_specs=[
                pl.BlockSpec((block_rows, D), lambda i: (i, 0)),
                pl.BlockSpec((block_rows, D), lambda i: (i, 0)),
                pl.BlockSpec((block_rows, D), lambda i: (i, 0)),
            ],
            out_specs=pl.BlockSpec((1, 8, 128), lambda i: (i, 0, 0)),
        ),
        compiler_params=pltpu.CompilerParams(
            dimension_semantics=("parallel",),   # independent per-block partials
            vmem_limit_bytes=int(vmem_limit_bytes),
        ),
    )(anchor, positive, negative)

    # Tiny finalize in the wrapper: one partial per block (broadcast across the tile).
    return jnp.sum(partials[:, 0, 0]) / jnp.float32(B)


def triplet_loss_ref(anchor, positive, negative, m=1.0):
    """Pure-JAX reference for verification (compute in f32)."""
    a = anchor.astype(jnp.float32)
    p = positive.astype(jnp.float32)
    n = negative.astype(jnp.float32)
    d_ap = jnp.sqrt(jnp.sum((a - p) ** 2, axis=-1))
    d_an = jnp.sqrt(jnp.sum((a - n) ** 2, axis=-1))
    return jnp.mean(jnp.maximum(d_ap - d_an + m, 0.0))


if __name__ == "__main__":
    key = jax.random.PRNGKey(0)

    # Case 1: small "nice" shapes (batch=16, hidden=128), f32, auto tile.
    B, D = 16, 128
    ka, kp, kn = jax.random.split(key, 3)
    anchor = jax.random.normal(ka, (B, D), dtype=jnp.float32)
    positive = jax.random.normal(kp, (B, D), dtype=jnp.float32)
    negative = jax.random.normal(kn, (B, D), dtype=jnp.float32)

    loss = triplet_loss(anchor, positive, negative, m=1.0)
    jax.block_until_ready(loss)
    ref = triplet_loss_ref(anchor, positive, negative, m=1.0)
    assert jnp.allclose(loss, ref, rtol=1e-5, atol=1e-5), (loss, ref)

    # Case 2: batch not divisible by the tile (exercises cdiv grid + last-tile mask).
    B2, D2 = 24, 128
    k2a, k2p, k2n = jax.random.split(jax.random.PRNGKey(1), 3)
    a2 = jax.random.normal(k2a, (B2, D2), dtype=jnp.float32)
    p2 = jax.random.normal(k2p, (B2, D2), dtype=jnp.float32)
    n2 = jax.random.normal(k2n, (B2, D2), dtype=jnp.float32)

    loss2 = triplet_loss(a2, p2, n2, m=0.5, block_rows=16)  # 2 blocks, last one partial
    jax.block_until_ready(loss2)
    ref2 = triplet_loss_ref(a2, p2, n2, m=0.5)
    assert jnp.allclose(loss2, ref2, rtol=1e-5, atol=1e-5), (loss2, ref2)

    # Case 3: bf16 inputs (bandwidth-bound path), f32 math in-kernel, auto tile.
    a3 = anchor.astype(jnp.bfloat16)
    p3 = positive.astype(jnp.bfloat16)
    n3 = negative.astype(jnp.bfloat16)
    loss3 = triplet_loss(a3, p3, n3, m=1.0)
    jax.block_until_ready(loss3)
    ref3 = triplet_loss_ref(a3, p3, n3, m=1.0)
    assert jnp.allclose(loss3, ref3, rtol=1e-5, atol=1e-5), (loss3, ref3)

    # Case 4: force the MXU row-reduction path (v7x/bf16 micro-opt) + partial tile.
    B4, D4 = 40, 256
    k4a, k4p, k4n = jax.random.split(jax.random.PRNGKey(2), 3)
    a4 = jax.random.normal(k4a, (B4, D4), dtype=jnp.float32).astype(jnp.bfloat16)
    p4 = jax.random.normal(k4p, (B4, D4), dtype=jnp.float32).astype(jnp.bfloat16)
    n4 = jax.random.normal(k4n, (B4, D4), dtype=jnp.float32).astype(jnp.bfloat16)
    loss4 = triplet_loss(a4, p4, n4, m=1.0, block_rows=16, use_mxu_reduce=True)
    jax.block_until_ready(loss4)
    ref4 = triplet_loss_ref(a4, p4, n4, m=1.0)
    assert jnp.allclose(loss4, ref4, rtol=1e-4, atol=1e-4), (loss4, ref4)

    print("KERNEL_OK")
</pallas_src>

<mosaic_0001>
module attributes {stable_mosaic.version = 11 : i64} {
  func.func @_triplet_partial_kernel(%arg0: i32, %arg1: memref<16x128xf32, #tpu.memory_space<vmem>>, %arg2: memref<16x128xf32, #tpu.memory_space<vmem>>, %arg3: memref<16x128xf32, #tpu.memory_space<vmem>>, %arg4: memref<1x8x128xf32, #tpu.memory_space<vmem>>) attributes {dimension_semantics = [#tpu.dimension_semantics<parallel>], iteration_bounds = array<i64: 1>, scalar_prefetch = 0 : i64, scratch_operands = 0 : i64, tpu.core_type = #tpu.core_type<tc>, window_params = [{transform_indices = @transform_0, window_bounds = array<i64: 16, 128>}, {transform_indices = @transform_1, window_bounds = array<i64: 16, 128>}, {transform_indices = @transform_2, window_bounds = array<i64: 16, 128>}, {transform_indices = @transform_3, window_bounds = array<i64: 1, 8, 128>}]} {
    %c0 = arith.constant 0 : index
    %c0_0 = arith.constant 0 : index
    %0 = vector.load %arg1[%c0, %c0_0] : memref<16x128xf32, #tpu.memory_space<vmem>>, vector<16x128xf32>
    %c0_1 = arith.constant 0 : index
    %c0_2 = arith.constant 0 : index
    %1 = vector.load %arg2[%c0_1, %c0_2] : memref<16x128xf32, #tpu.memory_space<vmem>>, vector<16x128xf32>
    %c0_3 = arith.constant 0 : index
    %c0_4 = arith.constant 0 : index
    %2 = vector.load %arg3[%c0_3, %c0_4] : memref<16x128xf32, #tpu.memory_space<vmem>>, vector<16x128xf32>
    %3 = arith.subf %0, %1 : vector<16x128xf32>
    %4 = arith.subf %0, %2 : vector<16x128xf32>
    %5 = arith.mulf %3, %3 : vector<16x128xf32>
    %cst = arith.constant dense<0.000000e+00> : vector<16xf32>
    %6 = vector.multi_reduction <add>, %5, %cst [1] : vector<16x128xf32> to vector<16xf32>
    %7 = vector.shape_cast %6 : vector<16xf32> to vector<16x1xf32>
    %8 = arith.mulf %4, %4 : vector<16x128xf32>
    %cst_5 = arith.constant dense<0.000000e+00> : vector<16xf32>
    %9 = vector.multi_reduction <add>, %8, %cst_5 [1] : vector<16x128xf32> to vector<16xf32>
    %10 = vector.shape_cast %9 : vector<16xf32> to vector<16x1xf32>
    %11 = math.sqrt %7 : vector<16x1xf32>
    %12 = math.sqrt %10 : vector<16x1xf32>
    %13 = arith.subf %11, %12 : vector<16x1xf32>
    %cst_6 = arith.constant 1.000000e+00 : f32
    %14 = vector.broadcast %cst_6 : f32 to vector<16x1xf32>
    %15 = arith.addf %13, %14 : vector<16x1xf32>
    %cst_7 = arith.constant 0.000000e+00 : f32
    %16 = vector.broadcast %cst_7 : f32 to vector<16x1xf32>
    %17 = arith.maximumf %15, %16 : vector<16x1xf32>
    %18 = vector.shape_cast %17 : vector<16x1xf32> to vector<1x16x1xf32>
    %cst_8 = arith.constant dense<0.000000e+00> : vector<1xf32>
    %19 = vector.multi_reduction <add>, %18, %cst_8 [1, 2] : vector<1x16x1xf32> to vector<1xf32>
    %20 = vector.shape_cast %19 : vector<1xf32> to vector<1x1x1xf32>
    %21 = vector.extract %20[0, 0, 0] : f32 from vector<1x1x1xf32>
    %22 = vector.broadcast %21 : f32 to vector<1x8x128xf32>
    %c0_9 = arith.constant 0 : index
    %c0_10 = arith.constant 0 : index
    %c0_11 = arith.constant 0 : index
    %23 = vector.load %arg4[%c0_9, %c0_10, %c0_11] : memref<1x8x128xf32, #tpu.memory_space<vmem>>, vector<1x8x128xf32>
    tpu.vector_store %arg4[%c0_9, %c0_10, %c0_11], %22 {strides = array<i32>} : memref<1x8x128xf32, #tpu.memory_space<vmem>>, vector<1x8x128xf32>,
    return
  }
  func.func @transform_0(%arg0: i32) -> (i32, i32) {
    %c0_i32 = arith.constant 0 : i32
    %c0_i32_0 = arith.constant 0 : i32
    return %arg0, %c0_i32 : i32, i32
  }
  func.func @transform_1(%arg0: i32) -> (i32, i32) {
    %c0_i32 = arith.constant 0 : i32
    %c0_i32_0 = arith.constant 0 : i32
    return %arg0, %c0_i32 : i32, i32
  }
  func.func @transform_2(%arg0: i32) -> (i32, i32) {
    %c0_i32 = arith.constant 0 : i32
    %c0_i32_0 = arith.constant 0 : i32
    return %arg0, %c0_i32 : i32, i32
  }
  func.func @transform_3(%arg0: i32) -> (i32, i32, i32) {
    %c0_i32 = arith.constant 0 : i32
    %c0_i32_0 = arith.constant 0 : i32
    %c0_i32_1 = arith.constant 0 : i32
    return %arg0, %c0_i32, %c0_i32_0 : i32, i32, i32
  }
}

</mosaic_0001>

<bundles_post_ra>
// kernel: tpu_custom_call.1
= control target key start
LH: loop header
LB: loop body
LE: loop exit
PB: predicated region body
PF: predicated region fallthrough
CT: control target
= control target key end

     0   :  { %8 = vsyncpa [#allocation3], 0  ;;  %s343_s0 = inlined_call_operand.hbm [shape: f32[16,128], index: 0, kind: input, shape index: {}]   ;;  %s344_s1 = inlined_call_operand.hbm [shape: f32[16,128], index: 1, kind: input, shape index: {}]   ;;  %s345_s2 = inlined_call_operand.hbm [shape: f32[16,128], index: 2, kind: input, shape index: {}]   ;;  %s346_s3 = inlined_call_operand.hbm [shape: f32[1,8,128], index: 3, kind: output, shape index: {}]  }
   0x1   :  { %9 = vsyncpa [#allocation6], 0 }
   0x2   :  { %10 = vsyncpa [#allocation4], 0  ;;  %s253_s12 = smov [#allocation5]   ;;  %s254_s14 = smov [#allocation2]  }
   0x3   :  { %s28_s13 = sshll.u32 %s253_s12, 4  ;;  %s16_s15 = sshll.u32 %s254_s14, 4  ;;  %s29_s13 = int_to_ptr.vmem [resolvable:$true] %s28_s13  ;;  %s279_s15 = int_to_ptr.vmem [resolvable:$true] %s16_s15 }
   0x4   :  { %s159_s18 = scalar_lea.hbm %s344_s1, 256 }
   0x5   :  { %p160_p0 = scmp.ne.s32.totalorder %s344_s1, %s159_s18  ;;  %p163_p1 = scmp.lt.u32.totalorder %s159_s18, %s344_s1 }
   0x7   :  { %p165_p2 = pnand %p163_p1, %p160_p0 }
   0x9   :  { %168 = shalt.err (!%p165_p2)
}
   0xa   :  { %s169_s23 = scalar_lea.vmem %s29_s13, 256  ;;  %p174_p4 = scmp.lt.s32.totalorder %s29_s13, %s29_s13 }
   0xb   :  { %p170_p3 = scmp.ne.s32.totalorder %s29_s13, %s169_s23  ;;  %p175_p5 = scmp.lt.s32.totalorder %s169_s23, %s169_s23 }
   0xd   :  { %p176_p6 = por %p175_p5, %p174_p4 }
   0xf   :  { %p177_p7 = pnand %p176_p6, %p170_p3 }
  0x11   :  { %180 = shalt.err (!%p177_p7)
}
  0x12   :  { %s255_s24 = smov 128   ;;  %s256_s25 = smov 8  }
  0x13   :  { %34 = dma.hbm_to_vmem [thread:$0]  %s344_s1, 256, %s29_s13, [#allocation6], %s255_s24, %s255_s24, %s256_s25  }
  0x14   :  { %s181_s30 = scalar_lea.hbm %s343_s0, 256 }
  0x15   :  { %p182_p8 = scmp.ne.s32.totalorder %s343_s0, %s181_s30  ;;  %p185_p9 = scmp.lt.u32.totalorder %s181_s30, %s343_s0 }
  0x17   :  { %p187_p10 = pnand %p185_p9, %p182_p8 }
  0x19   :  { %190 = shalt.err (!%p187_p10)
}
  0x1a   :  { %s191_s8 = scalar_lea.vmem %s279_s15, 256  ;;  %p196_p12 = scmp.lt.s32.totalorder %s279_s15, %s279_s15 }
  0x1b   :  { %p192_p11 = scmp.ne.s32.totalorder %s279_s15, %s191_s8  ;;  %p197_p13 = scmp.lt.s32.totalorder %s191_s8, %s191_s8 }
  0x1d   :  { %p198_p0 = por %p197_p13, %p196_p12 }
  0x1f   :  { %p199_p1 = pnand %p198_p0, %p192_p11 }
  0x21   :  { %202 = shalt.err (!%p199_p1)
}
  0x22   :  { %22 = dma.hbm_to_vmem [thread:$0]  %s343_s0, 256, %s279_s15, [#allocation3], %s255_s24, %s255_s24, %s256_s25  }
  0x23   :  { %s257_s10 = smov [#allocation7]   ;;  %s203_s14 = scalar_lea.hbm %s345_s2, 256 }
  0x24   :  { %s40_s11 = sshll.u32 %s257_s10, 4  ;;  %p204_p2 = scmp.ne.s32.totalorder %s345_s2, %s203_s14  ;;  %s41_s11 = int_to_ptr.vmem [resolvable:$true] %s40_s11 }
  0x25   :  { %p207_p3 = scmp.lt.u32.totalorder %s203_s14, %s345_s2 }
  0x27   :  { %p209_p4 = pnand %p207_p3, %p204_p2 }
  0x29   :  { %212 = shalt.err (!%p209_p4)
}
  0x2a   :  { %s213_s20 = scalar_lea.vmem %s41_s11, 256  ;;  %p218_p6 = scmp.lt.s32.totalorder %s41_s11, %s41_s11 }
  0x2b   :  { %p214_p5 = scmp.ne.s32.totalorder %s41_s11, %s213_s20  ;;  %p219_p7 = scmp.lt.s32.totalorder %s213_s20, %s213_s20 }
  0x2d   :  { %p220_p8 = por %p219_p7, %p218_p6 }
  0x2f   :  { %p221_p9 = pnand %p220_p8, %p214_p5 }
  0x31   :  { %224 = shalt.err (!%p221_p9)
}
  0x32   :  { %46 = dma.hbm_to_vmem [thread:$0]  %s345_s2, 256, %s41_s11, [#allocation6], %s255_s24, %s255_s24, %s256_s25  }
  0x33   :  { %247 = dma.done.wait [#allocation3], 256  }
  0x34   :  { %248 = vsyncadd [#allocation3], 4294967040 }
  0x35   :  { %249 = dma.done.wait [#allocation6], 512  }
  0x36   :  { %250 = vsyncadd [#allocation6], 4294966784  ;;  %v56_v0 = vld [vmem:[#allocation2] sm:$0xff]  ;;  %v58_v2 = vld [vmem:[#allocation5] sm:$0xff]  ;;  %vm112_vm8 = vcmask 7168   ;;  %s258_s2 = smov [#allocation8]  }
  0x37   :  { %v60_v1 = vld [vmem:[#allocation7] sm:$0xff]  ;;  %v62_v4 = vsub.f32 %v56_v0, %v58_v2  ;;  %v57_v5 = vld [vmem:[#allocation2 + $0x8] sm:$0xff]  ;;  %v59_v7 = vld [vmem:[#allocation5 + $0x8] sm:$0xff]  ;;  %s133_s21 = sshll.u32 %s258_s2, 4  ;;  %s134_s21 = int_to_ptr.vmem [resolvable:$true] %s133_s21 }
  0x38   :  { %v64_v3 = vsub.f32 %v56_v0, %v60_v1  ;;  %v61_v6 = vld [vmem:[#allocation7 + $0x8] sm:$0xff]  ;;  %v63_v9 = vsub.f32 %v57_v5, %v59_v7  ;;  %s225_s23 = scalar_lea.vmem %s134_s21, 128  ;;  %p230_p11 = scmp.lt.s32.totalorder %s134_s21, %s134_s21 }
  0x39   :  { %v65_v8 = vsub.f32 %v57_v5, %v61_v6  ;;  %v66_v11 = vmul.f32 %v62_v4, %v62_v4  ;;  %p226_p10 = scmp.ne.s32.totalorder %s134_s21, %s225_s23  ;;  %p231_p12 = scmp.lt.s32.totalorder %s225_s23, %s225_s23 }
  0x3a   :  { %v72_v10 = vmul.f32 %v64_v3, %v64_v3  ;;  %v67_v13 = vmul.f32 %v63_v9, %v63_v9 }
  0x3b   :  { %68 = vadd.xlane.f32.xlu0 %v66_v11  ;;  %v73_v12 = vmul.f32 %v65_v8, %v65_v8  ;;  %p232_p13 = por %p231_p12, %p230_p11 }
  0x3c   :  { %74 = vadd.xlane.f32.xlu1 %v72_v10 }
  0x3d   :  { %p233_p0 = pnand %p232_p13, %p226_p10 }
  0x3f   :  { %70 = vadd.xlane.f32.xlu0 %v67_v13 }
  0x40   :  { %76 = vadd.xlane.f32.xlu1 %v73_v12 }
  0xc8   :  { %v69_v15 = vpop.xlane.xlu0 %68 }
  0xc9   :  { %v75_v14 = vpop.xlane.xlu1 %74  ;;  %vm80_vm1 = vcmp.eq.f32.partialorder %v69_v15, inf  ;;  %v83_v23 = vand.u32 2147483648, %v69_v15  ;;  %vm82_vm3 = vcmp.eq.f32.partialorder %v69_v15, 0.0 }
  0xca   :  { %151 = vrsqrt.f32 %v75_v14  ;;  %vm94_vm0 = vcmp.eq.f32.partialorder %v75_v14, inf  ;;  %v97_v22 = vand.u32 2147483648, %v75_v14  ;;  %vm96_vm2 = vcmp.eq.f32.partialorder %v75_v14, 0.0 }
  0xcb   :  { %153 = vrsqrt.f32 %v69_v15 }
  0xcc   :  { %v71_v17 = vpop.xlane.xlu0 %70 }
  0xcd   :  { %v77_v16 = vpop.xlane.xlu1 %76  ;;  %vm87_vm6 = vcmp.eq.f32.partialorder %v71_v17, inf  ;;  %v90_v35 = vand.u32 2147483648, %v71_v17  ;;  %vm89_vm7 = vcmp.eq.f32.partialorder %v71_v17, 0.0 }
  0xce   :  { %155 = vrsqrt.f32 %v77_v16  ;;  %vm101_vm4 = vcmp.eq.f32.partialorder %v77_v16, inf  ;;  %v104_v31 = vand.u32 2147483648, %v77_v16  ;;  %vm103_vm5 = vcmp.eq.f32.partialorder %v77_v16, 0.0 }
  0xcf   :  { %157 = vrsqrt.f32 %v71_v17 }
  0xd4   :  { %v152_v18 = vpop.eup %151 }
  0xd5   :  { %v154_v19 = vpop.eup %153  ;;  %v93_v20 = vmul.f32 %v152_v18, %v75_v14 }
  0xd6   :  { %v79_v21 = vmul.f32 %v154_v19, %v69_v15 }
  0xd7   :  { %v95_v24 = vsel %vm94_vm0, %v75_v14, %v93_v20 }
  0xd8   :  { %v156_v25 = vpop.eup %155  ;;  %v81_v26 = vsel %vm80_vm1, %v69_v15, %v79_v21  ;;  %v98_v27 = vsel %vm96_vm2, %v97_v22, %v95_v24 }
  0xd9   :  { %v158_v28 = vpop.eup %157  ;;  %v100_v29 = vmul.f32 %v156_v25, %v77_v16  ;;  %v84_v30 = vsel %vm82_vm3, %v83_v23, %v81_v26 }
  0xda   :  { %v86_v32 = vmul.f32 %v158_v28, %v71_v17  ;;  %v106_v33 = vsub.f32 %v84_v30, %v98_v27 }
  0xdb   :  { %v102_v34 = vsel %vm101_vm4, %v77_v16, %v100_v29 }
  0xdc   :  { %v88_v36 = vsel %vm87_vm6, %v71_v17, %v86_v32  ;;  %v105_v37 = vsel %vm103_vm5, %v104_v31, %v102_v34  ;;  %v108_v38 = vadd.f32 1.0, %v106_v33 }
  0xdd   :  { %v91_v39 = vsel %vm89_vm7, %v90_v35, %v88_v36 }
  0xde   :  { %v107_v40 = vsub.f32 %v91_v39, %v105_v37  ;;  %v110_v42 = vmax.f32 %v108_v38, 0.0 }
  0xe0   :  { %v109_v41 = vadd.f32 1.0, %v107_v40  ;;  %v113_v44 = vsel %vm112_vm8, %v110_v42, 0.0 }
  0xe2   :  { %v111_v43 = vmax.f32 %v109_v41, 0.0 }
  0xe4   :  { %v114_v45 = vsel %vm112_vm8, %v111_v43, 0.0 }
  0xe5   :  { %v115_v46 = vadd.f32 %v114_v45, %v113_v44 }
  0xe7   :  { %116 = vadd.xlane.f32.xlu0 %v115_v46 }
 0x174   :  { %v117_v47 = vpop.xlane.xlu0 %116 }
 0x175   :  { %v118_v48 = vrot.slane %v117_v47, 4 }
 0x177   :  { %v119_v49 = vadd.f32 %v118_v48, %v117_v47 }
 0x179   :  { %v120_v50 = vrot.slane %v119_v49, 2 }
 0x17b   :  { %v121_v51 = vadd.f32 %v120_v50, %v119_v49 }
 0x17d   :  { %v122_v52 = vrot.slane %v121_v51, 1 }
 0x17f   :  { %v123_v53 = vadd.f32 %v122_v52, %v121_v51 }
 0x181   :  { %143 = vpush %v123_v53 }
 0x1b2   :  { %s144_s22 = spop %143 }
 0x1b3   :  { %v125_v54 = vstv %s144_s22 }
 0x1b4   :  { %126 = vst [vmem:[#allocation8] sm:$0xff] %v125_v54 }
 0x1b5   :  { %236 = shalt.err (!%p233_p0)
}
 0x1b6   :  { %s237_s26 = scalar_lea.hbm %s346_s3, 128 }
 0x1b7   :  { %p238_p1 = scmp.ne.s32.totalorder %s346_s3, %s237_s26  ;;  %p241_p2 = scmp.lt.u32.totalorder %s237_s26, %s346_s3 }
 0x1b9   :  { %p243_p3 = pnand %p241_p2, %p238_p1 }
 0x1bb   :  { %246 = shalt.err (!%p243_p3)
}
 0x1bc   :  { %136 = dma.vmem_to_hbm [thread:$0]  %s134_s21, 128, %s346_s3, [#allocation4]  }
 0x1bd   :  { %251 = dma.done.wait [#allocation4], 128  }
 0x1be   :  { %252 = vsyncadd [#allocation4], 4294967168 }
 0x1bf   :  { %140 = vsyncpa [#allocation3], 1 }
 0x1c0   :  { %141 = vsyncpa [#allocation6], 1 }
 0x1c1   :  { %142 = vsyncpa [#allocation4], 1 }

</bundles_post_ra>
